<compile_context>
chip_gen: v5e
topology: v5e:2x2
jax: 0.10.0
libtpu: 0.0.40
codegen_flags: <defaults>
</compile_context>

<pallas_src>
import functools

import jax
import jax.numpy as jnp
from jax import lax
from jax.experimental import pallas as pl
from jax.experimental.pallas import tpu as pltpu


# Contract dim 0 of BOTH operands ("LHS-transposed" matmul):
#   (IC, S') x (IC, tS) -> (S', tS)
_TN_DIMS = (((0,), (0,)), ((), ()))


# ---------------------------------------------------------------------------
# Fused non-local attention kernel: one (batch, S-tile) per grid step.
# ---------------------------------------------------------------------------
def _nl_attention_kernel(x_ref, phi_ref, g_ref, wt_ref, bt_ref, wz_ref, bz_ref,
                         o_ref):
    """Transposed layout: channels x tokens.

    x_ref:   (1, C,  tS)  flattened NCHW input tile (residual + theta source)
    phi_ref: (1, IC, S')  pooled phi features, channels-first (lane-dense)
    g_ref:   (1, IC, S')  pooled g features, channels-first
    wt_ref:  (IC, C)      theta 1x1-conv weight
    bt_ref:  (IC, 1)      theta bias (column)
    wz_ref:  (C, IC)      W_z 1x1-conv weight with eval-mode BN folded in
    bz_ref:  (C, 1)       folded W_z / BN bias (column)
    o_ref:   (1, C, tS)   output z tile (lane-dense: last dim = tS)
    """
    x_t = x_ref[0].astype(jnp.float32)                            # (C, tS)

    # theta^T = W_theta @ x^T + b_theta                           -> (IC, tS)
    theta_t = jnp.dot(wt_ref[...].astype(jnp.float32), x_t,
                      preferred_element_type=jnp.float32) + bt_ref[...]

    # f^T[s', s] = sum_ic phi[ic, s'] * theta^T[ic, s]            -> (S', tS)
    # bf16 MXU operands, f32 accumulation.
    scores_t = lax.dot_general(
        phi_ref[0].astype(jnp.bfloat16), theta_t.astype(jnp.bfloat16),
        dimension_numbers=_TN_DIMS, preferred_element_type=jnp.float32)

    # softmax over S' (= axis 0 in transposed layout); S-tiles independent.
    m = jnp.max(scores_t, axis=0, keepdims=True)                  # (1, tS)
    p = jnp.exp(scores_t - m)                                     # (S', tS) f32
    denom = jnp.sum(p, axis=0, keepdims=True)                     # (1, tS)
    inv_denom = pl.reciprocal(denom, approx=True)                 # EUP slot

    # y^T = g @ softmax(f)^T  (1/denom applied after the small matmul) -> (IC,tS)
    y_t = jnp.dot(g_ref[0].astype(jnp.bfloat16), p.astype(jnp.bfloat16),
                  preferred_element_type=jnp.float32) * inv_denom

    # z^T = W_z_eff @ y^T + b_eff + x^T                           -> (C, tS)
    out = jnp.dot(wz_ref[...].astype(jnp.float32), y_t,
                  preferred_element_type=jnp.float32)
    out = out + bz_ref[...] + x_t
    o_ref[0] = out.astype(o_ref.dtype)


# ---------------------------------------------------------------------------
# Plain-JAX helpers for the small g / phi branches.
# ---------------------------------------------------------------------------
def _conv1x1(x, w, b):
    # x: (B, Cin, H, W); w: (Cout, Cin); b: (Cout,)
    return jnp.einsum('bchw,oc->bohw', x, w) + b[None, :, None, None]


def _maxpool2x2(x):
    # nn.MaxPool2d(kernel_size=(2, 2)): stride 2, no padding (H, W even).
    B, C, H, W = x.shape
    return jnp.max(x.reshape(B, C, H // 2, 2, W // 2, 2), axis=(3, 5))


# ---------------------------------------------------------------------------
# Generation-aware tiling.
# ---------------------------------------------------------------------------
def _vmem_limit_bytes():
    """Scoped-VMEM limit with ~25% headroom vs. physical per-core capacity."""
    try:
        cap = int(pltpu.get_tpu_info().vmem_capacity_bytes)
    except Exception:
        cap = 64 * 1024 * 1024        # conservative: assume v7x (64 MiB / core)
    return min(int(cap * 0.75), 100 * 1024 * 1024)


def _choose_tile_s(S, Sp, C, IC, io_bytes, budget_bytes, max_ts):
    """Largest lane-aligned S-tile (divides S) whose per-step footprint fits."""
    def footprint(ts):
        f32 = 4
        io = 2 * 2 * C * ts * io_bytes                 # double-buffered x + out
        side = 2 * 2 * IC * Sp * io_bytes              # double-buffered phi + g
        inter = (2 * C * ts + 2 * IC * ts + 2 * Sp * ts) * f32  # x_t/out, theta/y, scores/p
        return io + side + inter

    if S % 128 != 0:
        return S                                       # full-dim block (always legal)
    cap = min(S, max_ts if max_ts is not None else 4096)
    cap = max(cap, 128)
    best = 128
    for ts in range(128, cap + 1, 128):
        if S % ts == 0 and footprint(ts) <= budget_bytes:
            best = ts
    return best


# ---------------------------------------------------------------------------
# Full forward pass.
# ---------------------------------------------------------------------------
@functools.partial(jax.jit, static_argnames=("max_ts",))
def nl_block_forward(x, density, params, max_ts=None):
    """Embedded-Gaussian NLBlockND forward (eval-mode BatchNorm). NCHW in/out."""
    B, C, H, W = x.shape
    Bd, Cd, Hd, Wd = density.shape
    assert Bd == B and (Hd, Wd) == (H, W), "density must match x spatially"
    assert H % 2 == 0 and W % 2 == 0

    IC = params['w_theta'].shape[0]
    S = H * W
    Sp = (H // 2) * (W // 2)

    # g / phi branches (1x1 conv + 2x2 max-pool) in plain JAX, channels-first
    # (no XLA-side transpose of phi; IC is contracted inside the kernel).
    # TODO(synk): fuse these as a second Pallas kernel if they ever dominate.
    g_t = _maxpool2x2(_conv1x1(x, params['w_g'], params['b_g'])).reshape(B, IC, Sp)
    phi_t = _maxpool2x2(
        _conv1x1(density, params['w_phi'], params['b_phi'])).reshape(B, IC, Sp)

    # Fold eval-mode BatchNorm into the W_z 1x1 conv (exact for inference).
    scale = params['bn_gamma'] / jnp.sqrt(params['bn_var'] + params['bn_eps'])
    wz_eff = params['w_z'] * scale[:, None]                        # (C, IC)
    bz_eff = (params['b_z'] - params['bn_mean']) * scale + params['bn_beta']

    x_flat = x.reshape(B, C, S)                                    # free reshape
    bt_col = params['b_theta'].reshape(IC, 1)
    bz_col = bz_eff.reshape(C, 1)

    vmem_limit = _vmem_limit_bytes()
    ts = _choose_tile_s(S, Sp, C, IC, x.dtype.itemsize,
                        int(vmem_limit * 0.8), max_ts)
    n_s = pl.cdiv(S, ts)                                           # ts divides S

    out = pl.pallas_call(
        _nl_attention_kernel,
        out_shape=jax.ShapeDtypeStruct((B, C, S), x.dtype),
        grid_spec=pltpu.PrefetchScalarGridSpec(
            num_scalar_prefetch=0,
            grid=(B, n_s),
            in_specs=[
                pl.BlockSpec((1, C, ts), lambda b, s: (b, 0, s)),   # x tile
                pl.BlockSpec((1, IC, Sp), lambda b, s: (b, 0, 0)),  # phi (ch-first)
                pl.BlockSpec((1, IC, Sp), lambda b, s: (b, 0, 0)),  # g   (ch-first)
                pl.BlockSpec((IC, C), lambda b, s: (0, 0)),         # W_theta
                pl.BlockSpec((IC, 1), lambda b, s: (0, 0)),         # b_theta
                pl.BlockSpec((C, IC), lambda b, s: (0, 0)),         # W_z (BN folded)
                pl.BlockSpec((C, 1), lambda b, s: (0, 0)),          # b_z (BN folded)
            ],
            out_specs=pl.BlockSpec((1, C, ts), lambda b, s: (b, 0, s)),
        ),
        compiler_params=pltpu.CompilerParams(
            dimension_semantics=("parallel", "parallel"),
            vmem_limit_bytes=vmem_limit),
    )(x_flat, phi_t, g_t, params['w_theta'], bt_col, wz_eff, bz_col)

    return out.reshape(B, C, H, W)


# ---------------------------------------------------------------------------
# Parameters (mirrors the nn.Conv2d 1x1 weight shapes, squeezed to 2-D).
# ---------------------------------------------------------------------------
def init_params(key, feat_channels, density_channels, inter_channels,
                dtype=jnp.float32):
    C, Cd, IC = feat_channels, density_channels, inter_channels
    ks = jax.random.split(key, 8)

    def u(k, shape, fan_in):
        s = 1.0 / jnp.sqrt(fan_in)
        return jax.random.uniform(k, shape, dtype, minval=-s, maxval=s)

    # NOTE: the PyTorch module initializes the BN weight/bias to zero (so
    # z == x at init); we use deterministic non-trivial values so the demo
    # exercises the whole path.
    return dict(
        w_g=u(ks[0], (IC, C), C),       b_g=u(ks[1], (IC,), C),
        w_theta=u(ks[2], (IC, C), C),   b_theta=u(ks[3], (IC,), C),
        w_phi=u(ks[4], (IC, Cd), Cd),   b_phi=u(ks[5], (IC,), Cd),
        w_z=u(ks[6], (C, IC), IC),      b_z=u(ks[7], (C,), IC),
        bn_gamma=jnp.linspace(0.5, 1.5, C, dtype=dtype),
        bn_beta=jnp.linspace(-0.1, 0.1, C, dtype=dtype),
        bn_mean=jnp.linspace(-0.05, 0.05, C, dtype=dtype),
        bn_var=jnp.linspace(0.8, 1.2, C, dtype=dtype),
        bn_eps=jnp.asarray(1e-5, dtype),
    )


# ---------------------------------------------------------------------------
# Pure-JAX reference mirroring the PyTorch forward (for verification).
# ---------------------------------------------------------------------------
def reference_forward(x, density, p):
    B, C, H, W = x.shape
    IC = p['w_theta'].shape[0]
    g_x = _maxpool2x2(_conv1x1(x, p['w_g'], p['b_g'])).reshape(B, IC, -1)
    g_x = jnp.transpose(g_x, (0, 2, 1))                            # (B, S', IC)
    theta_x = _conv1x1(x, p['w_theta'], p['b_theta']).reshape(B, IC, -1)
    theta_x = jnp.transpose(theta_x, (0, 2, 1))                    # (B, S, IC)
    phi_x = _maxpool2x2(
        _conv1x1(density, p['w_phi'], p['b_phi'])).reshape(B, IC, -1)
    f = jnp.einsum('bsi,bij->bsj', theta_x, phi_x)                 # (B, S, S')
    attn = jax.nn.softmax(f, axis=-1)
    y = jnp.einsum('bsj,bji->bsi', attn, g_x)                      # (B, S, IC)
    y = jnp.transpose(y, (0, 2, 1)).reshape(B, IC, H, W)
    w_y = _conv1x1(y, p['w_z'], p['b_z'])
    scale = p['bn_gamma'] / jnp.sqrt(p['bn_var'] + p['bn_eps'])
    w_y = (w_y - p['bn_mean'][None, :, None, None]) \
        * scale[None, :, None, None] + p['bn_beta'][None, :, None, None]
    return w_y + x


if __name__ == "__main__":
    # Small shapes consistent with the module: feat_channels=8 -> IC = 8//2 = 4.
    B, C, H, W = 2, 8, 16, 16
    Cd = 4
    IC = C // 2

    key = jax.random.PRNGKey(0)
    kx, kd, kp = jax.random.split(key, 3)
    x = jax.random.normal(kx, (B, C, H, W), jnp.float32)
    density = jax.random.normal(kd, (B, Cd, H, W), jnp.float32)
    params = init_params(kp, C, Cd, IC)

    ref = reference_forward(x, density, params)

    # Default tiling (S = 256 fits in one tile).
    out = nl_block_forward(x, density, params)
    jax.block_until_ready(out)
    assert out.shape == (B, C, H, W), out.shape
    # bf16 MXU operands + approx reciprocal -> relax tolerance vs f32 reference.
    assert jnp.allclose(out, ref, atol=5e-2, rtol=5e-2), \
        float(jnp.max(jnp.abs(out - ref)))

    # Force S-tiling (grid = (B, 2)) to exercise the tiled path as well.
    out_tiled = nl_block_forward(x, density, params, max_ts=128)
    jax.block_until_ready(out_tiled)
    assert jnp.allclose(out_tiled, ref, atol=5e-2, rtol=5e-2), \
        float(jnp.max(jnp.abs(out_tiled - ref)))

    print("KERNEL_OK")
</pallas_src>

<mosaic_0001>
module attributes {stable_mosaic.version = 11 : i64} {
  func.func @_nl_attention_kernel(%arg0: i32, %arg1: i32, %arg2: memref<1x8x256xf32, #tpu.memory_space<vmem>>, %arg3: memref<1x4x64xf32, #tpu.memory_space<vmem>>, %arg4: memref<1x4x64xf32, #tpu.memory_space<vmem>>, %arg5: memref<4x8xf32, #tpu.memory_space<vmem>>, %arg6: memref<4x1xf32, #tpu.memory_space<vmem>>, %arg7: memref<8x4xf32, #tpu.memory_space<vmem>>, %arg8: memref<8x1xf32, #tpu.memory_space<vmem>>, %arg9: memref<1x8x256xf32, #tpu.memory_space<vmem>>) attributes {dimension_semantics = [#tpu.dimension_semantics<parallel>, #tpu.dimension_semantics<parallel>], iteration_bounds = array<i64: 2, 1>, scalar_prefetch = 0 : i64, scratch_operands = 0 : i64, tpu.core_type = #tpu.core_type<tc>, window_params = [{transform_indices = @transform_0, window_bounds = array<i64: 1, 8, 256>}, {transform_indices = @transform_1, window_bounds = array<i64: 1, 4, 64>}, {transform_indices = @transform_2, window_bounds = array<i64: 1, 4, 64>}, {pipeline_mode = #tpu.pipeline_mode<synchronous>, transform_indices = @transform_3, window_bounds = array<i64: 4, 8>}, {pipeline_mode = #tpu.pipeline_mode<synchronous>, transform_indices = @transform_4, window_bounds = array<i64: 4, 1>}, {pipeline_mode = #tpu.pipeline_mode<synchronous>, transform_indices = @transform_5, window_bounds = array<i64: 8, 4>}, {pipeline_mode = #tpu.pipeline_mode<synchronous>, transform_indices = @transform_6, window_bounds = array<i64: 8, 1>}, {transform_indices = @transform_7, window_bounds = array<i64: 1, 8, 256>}]} {
    %c0 = arith.constant 0 : index
    %c0_0 = arith.constant 0 : index
    %c0_1 = arith.constant 0 : index
    %0 = vector.load %arg2[%c0, %c0_0, %c0_1] : memref<1x8x256xf32, #tpu.memory_space<vmem>>, vector<1x8x256xf32>
    %1 = vector.shape_cast %0 : vector<1x8x256xf32> to vector<8x256xf32>
    %c0_2 = arith.constant 0 : index
    %c0_3 = arith.constant 0 : index
    %2 = vector.load %arg5[%c0_2, %c0_3] : memref<4x8xf32, #tpu.memory_space<vmem>>, vector<4x8xf32>
    %cst = arith.constant dense<0.000000e+00> : vector<4x256xf32>
    %3 = tpu.matmul %2, %1, %cst {dimension_numbers = #tpu.dot_dimension_numbers<[1], [0], [0], [1], [0, 0, 1, 1], [], []>} : vector<4x8xf32>, vector<8x256xf32>, vector<4x256xf32> -> vector<4x256xf32>
    %c0_4 = arith.constant 0 : index
    %c0_5 = arith.constant 0 : index
    %4 = vector.load %arg6[%c0_4, %c0_5] : memref<4x1xf32, #tpu.memory_space<vmem>>, vector<4x1xf32>
    %5 = vector.broadcast %4 : vector<4x1xf32> to vector<4x256xf32>
    %6 = arith.addf %3, %5 : vector<4x256xf32>
    %c0_6 = arith.constant 0 : index
    %c0_7 = arith.constant 0 : index
    %c0_8 = arith.constant 0 : index
    %7 = vector.load %arg3[%c0_6, %c0_7, %c0_8] : memref<1x4x64xf32, #tpu.memory_space<vmem>>, vector<1x4x64xf32>
    %8 = vector.shape_cast %7 : vector<1x4x64xf32> to vector<4x64xf32>
    %9 = arith.truncf %8 : vector<4x64xf32> to vector<4x64xbf16>
    %10 = arith.truncf %6 : vector<4x256xf32> to vector<4x256xbf16>
    %cst_9 = arith.constant dense<0.000000e+00> : vector<64x256xf32>
    %11 = tpu.matmul %9, %10, %cst_9 {dimension_numbers = #tpu.dot_dimension_numbers<[0], [0], [1], [1], [0, 1, 1, 1], [], []>} : vector<4x64xbf16>, vector<4x256xbf16>, vector<64x256xf32> -> vector<64x256xf32>
    %cst_10 = arith.constant dense<0xFF800000> : vector<256xf32>
    %12 = vector.multi_reduction <maximumf>, %11, %cst_10 [0] : vector<64x256xf32> to vector<256xf32>
    %13 = vector.shape_cast %12 : vector<256xf32> to vector<1x256xf32>
    %14 = vector.broadcast %13 : vector<1x256xf32> to vector<64x256xf32>
    %15 = arith.subf %11, %14 : vector<64x256xf32>
    %16 = math.exp %15 : vector<64x256xf32>
    %cst_11 = arith.constant dense<0.000000e+00> : vector<256xf32>
    %17 = vector.multi_reduction <add>, %16, %cst_11 [0] : vector<64x256xf32> to vector<256xf32>
    %18 = vector.shape_cast %17 : vector<256xf32> to vector<1x256xf32>
    %19 = tpu.reciprocal %18 {approx = true} : vector<1x256xf32> -> vector<1x256xf32>
    %c0_12 = arith.constant 0 : index
    %c0_13 = arith.constant 0 : index
    %c0_14 = arith.constant 0 : index
    %20 = vector.load %arg4[%c0_12, %c0_13, %c0_14] : memref<1x4x64xf32, #tpu.memory_space<vmem>>, vector<1x4x64xf32>
    %21 = vector.shape_cast %20 : vector<1x4x64xf32> to vector<4x64xf32>
    %22 = arith.truncf %21 : vector<4x64xf32> to vector<4x64xbf16>
    %23 = arith.truncf %16 : vector<64x256xf32> to vector<64x256xbf16>
    %cst_15 = arith.constant dense<0.000000e+00> : vector<4x256xf32>
    %24 = tpu.matmul %22, %23, %cst_15 {dimension_numbers = #tpu.dot_dimension_numbers<[1], [0], [0], [1], [0, 0, 1, 1], [], []>} : vector<4x64xbf16>, vector<64x256xbf16>, vector<4x256xf32> -> vector<4x256xf32>
    %25 = vector.broadcast %19 : vector<1x256xf32> to vector<4x256xf32>
    %26 = arith.mulf %24, %25 : vector<4x256xf32>
    %c0_16 = arith.constant 0 : index
    %c0_17 = arith.constant 0 : index
    %27 = vector.load %arg7[%c0_16, %c0_17] : memref<8x4xf32, #tpu.memory_space<vmem>>, vector<8x4xf32>
    %cst_18 = arith.constant dense<0.000000e+00> : vector<8x256xf32>
    %28 = tpu.matmul %27, %26, %cst_18 {dimension_numbers = #tpu.dot_dimension_numbers<[1], [0], [0], [1], [0, 0, 1, 1], [], []>} : vector<8x4xf32>, vector<4x256xf32>, vector<8x256xf32> -> vector<8x256xf32>
    %c0_19 = arith.constant 0 : index
    %c0_20 = arith.constant 0 : index
    %29 = vector.load %arg8[%c0_19, %c0_20] : memref<8x1xf32, #tpu.memory_space<vmem>>, vector<8x1xf32>
    %30 = vector.broadcast %29 : vector<8x1xf32> to vector<8x256xf32>
    %31 = arith.addf %28, %30 : vector<8x256xf32>
    %32 = arith.addf %31, %1 : vector<8x256xf32>
    %c0_21 = arith.constant 0 : index
    %c0_22 = arith.constant 0 : index
    %c0_23 = arith.constant 0 : index
    %33 = vector.load %arg9[%c0_21, %c0_22, %c0_23] : memref<1x8x256xf32, #tpu.memory_space<vmem>>, vector<1x8x256xf32>
    %34 = vector.shape_cast %33 : vector<1x8x256xf32> to vector<8x256xf32>
    %35 = vector.shape_cast %32 : vector<8x256xf32> to vector<1x8x256xf32>
    tpu.vector_store %arg9[%c0_21, %c0_22, %c0_23], %35 {strides = array<i32>} : memref<1x8x256xf32, #tpu.memory_space<vmem>>, vector<1x8x256xf32>,
    return
  }
  func.func @transform_0(%arg0: i32, %arg1: i32) -> (i32, i32, i32) {
    %c0_i32 = arith.constant 0 : i32
    %c0_i32_0 = arith.constant 0 : i32
    return %arg0, %c0_i32, %arg1 : i32, i32, i32
  }
  func.func @transform_1(%arg0: i32, %arg1: i32) -> (i32, i32, i32) {
    %c0_i32 = arith.constant 0 : i32
    %c0_i32_0 = arith.constant 0 : i32
    %c0_i32_1 = arith.constant 0 : i32
    return %arg0, %c0_i32, %c0_i32_0 : i32, i32, i32
  }
  func.func @transform_2(%arg0: i32, %arg1: i32) -> (i32, i32, i32) {
    %c0_i32 = arith.constant 0 : i32
    %c0_i32_0 = arith.constant 0 : i32
    %c0_i32_1 = arith.constant 0 : i32
    return %arg0, %c0_i32, %c0_i32_0 : i32, i32, i32
  }
  func.func @transform_3(%arg0: i32, %arg1: i32) -> (i32, i32) {
    %c0_i32 = arith.constant 0 : i32
    %c0_i32_0 = arith.constant 0 : i32
    %c0_i32_1 = arith.constant 0 : i32
    return %c0_i32, %c0_i32_0 : i32, i32
  }
  func.func @transform_4(%arg0: i32, %arg1: i32) -> (i32, i32) {
    %c0_i32 = arith.constant 0 : i32
    %c0_i32_0 = arith.constant 0 : i32
    %c0_i32_1 = arith.constant 0 : i32
    return %c0_i32, %c0_i32_0 : i32, i32
  }
  func.func @transform_5(%arg0: i32, %arg1: i32) -> (i32, i32) {
    %c0_i32 = arith.constant 0 : i32
    %c0_i32_0 = arith.constant 0 : i32
    %c0_i32_1 = arith.constant 0 : i32
    return %c0_i32, %c0_i32_0 : i32, i32
  }
  func.func @transform_6(%arg0: i32, %arg1: i32) -> (i32, i32) {
    %c0_i32 = arith.constant 0 : i32
    %c0_i32_0 = arith.constant 0 : i32
    %c0_i32_1 = arith.constant 0 : i32
    return %c0_i32, %c0_i32_0 : i32, i32
  }
  func.func @transform_7(%arg0: i32, %arg1: i32) -> (i32, i32, i32) {
    %c0_i32 = arith.constant 0 : i32
    %c0_i32_0 = arith.constant 0 : i32
    return %arg0, %c0_i32, %arg1 : i32, i32, i32
  }
}

</mosaic_0001>

<bundles_post_ra>
// kernel: nl_block_forward.1
= control target key start
LH: loop header
LB: loop body
LE: loop exit
PB: predicated region body
PF: predicated region fallthrough
CT: control target
= control target key end

     0   :  { %s979_s24 = smov 0   ;;  %s981_s25 = smov 0   ;;  %s1096_s0 = inlined_call_operand.vmem [shape: f32[2,8,256], index: 0, kind: input, shape index: {}]   ;;  %s1097_s1 = inlined_call_operand.vmem [shape: f32[2,4,64], index: 1, kind: input, shape index: {}]   ;;  %s1098_s2 = inlined_call_operand.vmem [shape: f32[2,4,64], index: 2, kind: input, shape index: {}]   ;;  %s1099_s3 = inlined_call_operand.vmem [shape: f32[4,8], index: 3, kind: input, shape index: {}]   ;;  %s1100_s4 = inlined_call_operand.vmem [shape: f32[4,1], index: 4, kind: input, shape index: {}]   ;;  %s1101_s5 = inlined_call_operand.vmem [shape: f32[8,4], index: 5, kind: input, shape index: {}]   ;;  %s1102_s6 = inlined_call_operand.vmem [shape: f32[8,1], index: 6, kind: input, shape index: {}]   ;;  %s1103_s7 = inlined_call_operand.vmem [shape: f32[2,8,256], index: 7, kind: output, shape index: {}]  }
   0x1   :  { %s983_s26 = smov 0  }
   0x2 LB: > { %s29_s27 = sadd.s32 1, %s932_s25  ;;  %p824_p0 = scmp.ge.s32.totalorder %s936_s26, 1  ;;  %s936_s26 = sphi %s983_s26, %s17_s26   ;;  %s932_s25 = sphi %s981_s25, %s1105_s25   ;;  %s928_s24 = sphi %s979_s24, %s1104_s24  }
   0x3   : > { %p31_p1 = scmp.ge.s32.totalorder %s29_s27, 2  ;;  %p276_p2 = scmp.lt.s32.totalorder %s936_s26, 3 }
   0x5   : > { %s1107_s27 = smov (%p31_p1, %s29_s27), 0  ;;  %p277_p3 = pnand %p824_p0, %p276_p2 }
   0x6   : > { %p325_p4 = scmp.lt.s32.totalorder (!%p277_p3), %s928_s24, 1 }
   0x7   : > { %280 = sbr.rel (%p277_p3) target bundleno = 727 (0x2d7), region = 48 }
   0xc   : > { %v356_v0 = vld [vmem:[%s1100_s4] sm:$0xf]  ;;  %v938_v1 = vmov 0   ;;  %s1109_s24 = smov (!%p325_p4, %s928_s24), 1  ;;  %vm362_vm0 = vcmask 64512   ;;  %vm439_vm1 = vcmask 1041408  }
   0xd   : > { %876 = vset.pattern.permute.xlu0 %v938_v1  ;;  %877 = vset.pattern.permute.xlu1 %v938_v1  ;;  %s849_s30 = sshll.u32 %s1109_s24, 4  ;;  %v355_v2 = vld [vmem:[%s1099_s3] sm:$0xf]  ;;  %s827_s13 = sshll.u32 %s1109_s24, 2  ;;  %vm426_vm2 = vcmask 31744   ;;  %vm616_vm3 = vcmask 523264  }
   0xe   : > { %359 = vperm.xlu0 %876, %v356_v0   ;;  %s332_s10 = scalar_lea.vmem %s1096_s0, %s849_s30  ;;  %s337_s16 = scalar_lea.vmem %s1097_s1, %s827_s13  ;;  %vm658_vm4 = vcmask 1043456  }
   0xf   : > { %v1011_v3 = vld [vmem:[%s332_s10] sm:$0xff]  ;;  %v1013_v4 = vld [vmem:[%s332_s10 + $0x8] sm:$0xff]  ;;  %s341_s19 = scalar_lea.vmem %s1098_s2, %s827_s13  ;;  %s350_s8 = scalar_lea.vmem %s1103_s7, %s849_s30 }
  0x10   : > { %381 = vmatpush.msra.mxu0 %v1011_v3  ;;  %401 = vmatpush.msra.mxu1 %v1013_v4  ;;  %v406_v5 = vld [vmem:[%s337_s16] sm:$0xf] }
  0x11   : > { %831 = vmatmul.msk.f32.vlgmr.msra.gmra.mxu0 %vm362_vm0, %v355_v2  ;;  %832 = vmatmul.msk.f32.vlgmr.msra.gmra.mxu1 %vm362_vm0, %v355_v2  ;;  %v407_v6 = vpack.c.bf16 %v406_v5, %v406_v5 }
  0x30   : > { %410 = vxpose.xlu0.c.b16.start.end [1/1] (short) (narrow) %v407_v6, 64 }
  0x80   : > { %v360_v7 = vpop.permute.xlu0 %359 }
  0x8e   : > { %v383_v8 = vpop.f32.mrf.mxu0  ;;  %v403_v9 = vpop.f32.mrf.mxu1 }
  0x8f   : > { %v384_v10 = vadd.f32 %v383_v8, %v360_v7  ;;  %v404_v11 = vadd.f32 %v403_v9, %v360_v7 }
  0x91   : > { %v408_v12 = vpack.c.bf16 %v384_v10, %v384_v10  ;;  %v409_v13 = vpack.c.bf16 %v404_v11, %v404_v11 }
  0x93   : > { %v441_v14 = vsel %vm439_vm1, %v408_v12, 0  ;;  %v444_v15 = vsel %vm439_vm1, %v409_v13, 0 }
  0x94   : > { %453 = vmatpush.bf16.msra.mxu2 %v441_v14  ;;  %482 = vmatpush.bf16.msra.mxu3 %v444_v15 }
  0xdc   : > { %v418_v16 = vpop.trf.xlu0 }
  0xdd   : > { %833 = vmatmul.msk.bf16.vlgmr.msra.gmra.mxu2 %vm426_vm2, %v418_v16  ;;  %837 = vmatmul.msk.bf16.vlgmr.msra.gmra.mxu3 %vm426_vm2, %v418_v16 }
  0xec   : > { %v419_v17 = vpop.trf.xlu0 }
  0xed   : > { %834 = vmatmul.msk.bf16.gmra.mxu2 %vm426_vm2, %v419_v17  ;;  %838 = vmatmul.msk.bf16.gmra.mxu3 %vm426_vm2, %v419_v17 }
  0xfc   : > { %v420_v18 = vpop.trf.xlu0 }
  0xfd   : > { %835 = vmatmul.msk.bf16.gmra.mxu2 %vm426_vm2, %v420_v18  ;;  %839 = vmatmul.msk.bf16.gmra.mxu3 %vm426_vm2, %v420_v18 }
 0x10c   : > { %v421_v19 = vpop.trf.xlu0 }
 0x10d   : > { %836 = vmatmul.msk.bf16.gmra.mxu2 %vm426_vm2, %v421_v19  ;;  %840 = vmatmul.msk.bf16.gmra.mxu3 %vm426_vm2, %v421_v19 }
 0x160   : > { %v455_v20 = vpop.f32.mrf.mxu2  ;;  %v1031_v21 = vpop.f32.mrf.mxu3 }
 0x168   : > { %v457_v22 = vpop.f32.mrf.mxu2  ;;  %v1033_v23 = vpop.f32.mrf.mxu3 }
 0x170   : > { %v460_v24 = vpop.f32.mrf.mxu2  ;;  %v1035_v25 = vpop.f32.mrf.mxu3 }
 0x171   : > { %v504_v34 = vmax.f32 %v455_v20, %v460_v24  ;;  %v517_v35 = vmax.f32 %v1031_v21, %v1035_v25 }
 0x178   : > { %v462_v26 = vpop.f32.mrf.mxu2  ;;  %v1037_v27 = vpop.f32.mrf.mxu3 }
 0x179   : > { %v505_v36 = vmax.f32 %v457_v22, %v462_v26  ;;  %v518_v37 = vmax.f32 %v1033_v23, %v1037_v27 }
 0x180   : > { %v465_v28 = vpop.f32.mrf.mxu2  ;;  %v1039_v29 = vpop.f32.mrf.mxu3 }
 0x181   : > { %v506_v38 = vmax.f32 %v504_v34, %v465_v28  ;;  %v519_v39 = vmax.f32 %v517_v35, %v1039_v29 }
 0x188   : > { %v467_v30 = vpop.f32.mrf.mxu2  ;;  %v1041_v31 = vpop.f32.mrf.mxu3 }
 0x189   : > { %v507_v40 = vmax.f32 %v505_v36, %v467_v30  ;;  %v520_v41 = vmax.f32 %v518_v37, %v1041_v31 }
 0x190   : > { %v470_v32 = vpop.f32.mrf.mxu2  ;;  %v1043_v33 = vpop.f32.mrf.mxu3 }
 0x191   : > { %v508_v44 = vmax.f32 %v506_v38, %v470_v32  ;;  %v521_v45 = vmax.f32 %v519_v39, %v1043_v33 }
 0x198   : > { %v472_v42 = vpop.f32.mrf.mxu2  ;;  %v1051_v43 = vpop.f32.mrf.mxu3 }
 0x199   : > { %v509_v46 = vmax.f32 %v507_v40, %v472_v42  ;;  %v522_v47 = vmax.f32 %v520_v41, %v1051_v43 }
 0x19b   : > { %v510_v48 = vmax.f32 %v508_v44, %v509_v46  ;;  %v523_v49 = vmax.f32 %v521_v45, %v522_v47 }
 0x19d   : > { %v511_v50 = vrot.slane %v510_v48, 4  ;;  %v524_v51 = vrot.slane %v523_v49, 4 }
 0x19f   : > { %v512_v52 = vmax.f32 %v510_v48, %v511_v50  ;;  %v525_v53 = vmax.f32 %v523_v49, %v524_v51 }
 0x1a1   : > { %v513_v54 = vrot.slane %v512_v52, 2  ;;  %v526_v55 = vrot.slane %v525_v53, 2 }
 0x1a3   : > { %v514_v56 = vmax.f32 %v512_v52, %v513_v54  ;;  %v527_v57 = vmax.f32 %v525_v53, %v526_v55 }
 0x1a5   : > { %v515_v58 = vrot.slane %v514_v56, 1  ;;  %v528_v59 = vrot.slane %v527_v57, 1 }
 0x1a7   : > { %v516_v60 = vmax.f32 %v514_v56, %v515_v58  ;;  %v529_v61 = vmax.f32 %v527_v57, %v528_v59 }
 0x1a9   : > { %v530_v62 = vsub.f32 %v455_v20, %v516_v60  ;;  %v532_v63 = vsub.f32 %v457_v22, %v516_v60  ;;  %v534_v0 = vsub.f32 %v460_v24, %v516_v60  ;;  %v536_v1 = vsub.f32 %v462_v26, %v516_v60 }
 0x1aa   : > { %v538_v2 = vsub.f32 %v465_v28, %v516_v60  ;;  %v540_v5 = vsub.f32 %v467_v30, %v516_v60  ;;  %v542_v6 = vsub.f32 %v470_v32, %v516_v60  ;;  %v544_v10 = vsub.f32 %v472_v42, %v516_v60 }
 0x1ab   : > { %v546_v7 = vmul.f32 1.442695, %v530_v62  ;;  %v550_v8 = vmul.f32 1.442695, %v532_v63  ;;  %v554_v9 = vmul.f32 1.442695, %v534_v0  ;;  %v531_v13 = vsub.f32 %v1031_v21, %v529_v61 }
 0x1ac   : > { %v558_v11 = vmul.f32 1.442695, %v536_v1  ;;  %v562_v12 = vmul.f32 1.442695, %v538_v2  ;;  %v566_v14 = vmul.f32 1.442695, %v540_v5  ;;  %v533_v15 = vsub.f32 %v1033_v23, %v529_v61 }
 0x1ad   : > { %878 = vpow2.f32 %v546_v7  ;;  %v570_v16 = vmul.f32 1.442695, %v542_v6  ;;  %v574_v17 = vmul.f32 1.442695, %v544_v10  ;;  %v535_v18 = vsub.f32 %v1035_v25, %v529_v61  ;;  %v606_v63 = vld [vmem:[%s341_s19] sm:$0xf] }
 0x1ae   : > { %880 = vpow2.f32 %v550_v8  ;;  %v537_v19 = vsub.f32 %v1037_v27, %v529_v61  ;;  %v548_v20 = vmul.f32 1.442695, %v531_v13  ;;  %v539_v22 = vsub.f32 %v1039_v29, %v529_v61 }
 0x1af   : > { %882 = vpow2.f32 %v554_v9  ;;  %v552_v24 = vmul.f32 1.442695, %v533_v15  ;;  %v543_v21 = vsub.f32 %v1043_v33, %v529_v61  ;;  %v545_v28 = vsub.f32 %v1051_v43, %v529_v61 }
 0x1b0   : > { %884 = vpow2.f32 %v558_v11  ;;  %v556_v30 = vmul.f32 1.442695, %v535_v18  ;;  %v560_v27 = vmul.f32 1.442695, %v537_v19  ;;  %v541_v35 = vsub.f32 %v1041_v31, %v529_v61 }
 0x1b1   : > { %886 = vpow2.f32 %v562_v12  ;;  %v564_v29 = vmul.f32 1.442695, %v539_v22  ;;  %v572_v38 = vmul.f32 1.442695, %v543_v21  ;;  %v576_v33 = vmul.f32 1.442695, %v545_v28 }
 0x1b2   : > { %888 = vpow2.f32 %v566_v14  ;;  %v568_v43 = vmul.f32 1.442695, %v541_v35  ;;  %v607_v6 = vpack.c.bf16 %v606_v63, %v606_v63  ;;  %v648_v28 = vld [vmem:[%s1101_s5] sm:$0xff] }
 0x1b3   : > { %v1060_v26 = vpop.eup %878  ;;  %890 = vpow2.f32 %v570_v16  ;;  %v649_v16 = vld [vmem:[%s1102_s6] sm:$0xff] }
 0x1b4   : > { %v881_v23 = vpop.eup %880  ;;  %892 = vpow2.f32 %v574_v17  ;;  %652 = vperm.xlu1 %877, %v649_v16  }
 0x1b5   : > { %v883_v32 = vpop.eup %882  ;;  %v578_v25 = vadd.f32 %v881_v23, %v1060_v26  ;;  %894 = vpow2.f32 %v548_v20  ;;  %v608_v5 = vpack.c.bf16 %v881_v23, %v1060_v26 }
 0x1b6   : > { %v885_v34 = vpop.eup %884  ;;  %896 = vpow2.f32 %v552_v24 }
 0x1b7   : > { %v887_v36 = vpop.eup %886  ;;  %v579_v37 = vadd.f32 %v883_v32, %v578_v25  ;;  %898 = vpow2.f32 %v556_v30  ;;  %v610_v61 = vpack.c.bf16 %v885_v34, %v883_v32 }
 0x1b8   : > { %v889_v39 = vpop.eup %888  ;;  %900 = vpow2.f32 %v560_v27 }
 0x1b9   : > { %v891_v40 = vpop.eup %890  ;;  %v580_v41 = vadd.f32 %v885_v34, %v579_v37  ;;  %902 = vpow2.f32 %v564_v29  ;;  %v612_v53 = vpack.c.bf16 %v889_v39, %v887_v36 }
 0x1ba   : > { %v893_v42 = vpop.eup %892  ;;  %904 = vpow2.f32 %v572_v38 }
 0x1bb   : > { %v895_v44 = vpop.eup %894  ;;  %v581_v45 = vadd.f32 %v887_v36, %v580_v41  ;;  %v614_v46 = vpack.c.bf16 %v893_v42, %v891_v40  ;;  %906 = vpow2.f32 %v576_v33 }
 0x1bc   : > { %v897_v47 = vpop.eup %896  ;;  %908 = vpow2.f32 %v568_v43 }
 0x1bd   : > { %v582_v31 = vadd.f32 %v889_v39, %v581_v45  ;;  %v591_v48 = vadd.f32 %v897_v47, %v895_v44  ;;  %624 = vmatpush.bf16.msrb.mxu0 %v614_v46  ;;  %v899_v49 = vpop.eup %898  ;;  %v609_v9 = vpack.c.bf16 %v897_v47, %v895_v44 }
 0x1be   : > { %v901_v50 = vpop.eup %900 }
 0x1bf   : > { %v583_v51 = vadd.f32 %v891_v40, %v582_v31  ;;  %v592_v52 = vadd.f32 %v899_v49, %v591_v48  ;;  %v903_v54 = vpop.eup %902  ;;  %v611_v8 = vpack.c.bf16 %v901_v50, %v899_v49 }
 0x1c0   : > { %v905_v55 = vpop.eup %904 }
 0x1c1   : > { %v584_v56 = vadd.f32 %v893_v42, %v583_v51  ;;  %v593_v57 = vadd.f32 %v901_v50, %v592_v52  ;;  %625 = vmatpush.bf16.msrb.mxu0 %v612_v53  ;;  %v907_v58 = vpop.eup %906 }
 0x1c2   : > { %v615_v60 = vpack.c.bf16 %v907_v58, %v905_v55  ;;  %v909_v62 = vpop.eup %908 }
 0x1c3   : > { %v594_v59 = vadd.f32 %v903_v54, %v593_v57  ;;  %v613_v2 = vpack.c.bf16 %v909_v62, %v903_v54  ;;  %v585_v10 = vrot.slane %v584_v56, 4 }
 0x1c4   : > { %637 = vmatpush.bf16.msrb.mxu1 %v615_v60 }
 0x1c5   : > { %v595_v0 = vadd.f32 %v909_v62, %v594_v59  ;;  %626 = vmatpush.bf16.msrb.mxu0 %v610_v61  ;;  %v586_v11 = vadd.f32 %v585_v10, %v584_v56 }
 0x1c7   : > { %v596_v1 = vadd.f32 %v905_v55, %v595_v0  ;;  %v587_v13 = vrot.slane %v586_v11, 2 }
 0x1c8   : > { %638 = vmatpush.bf16.msrb.mxu1 %v613_v2 }
 0x1c9   : > { %v597_v7 = vadd.f32 %v907_v58, %v596_v1  ;;  %627 = vmatpush.bf16.msrb.mxu0 %v608_v5  ;;  %v588_v15 = vadd.f32 %v587_v13, %v586_v11 }
 0x1cb   : > { %v598_v12 = vrot.slane %v597_v7, 4  ;;  %v589_v17 = vrot.slane %v588_v15, 1 }
 0x1cc   : > { %841 = vmatmul.msk.bf16.vlgmr.msrb.gmra.mxu0 %vm616_vm3, %v607_v6  ;;  %639 = vmatpush.bf16.msrb.mxu1 %v611_v8 }
 0x1cd   : > { %v599_v14 = vadd.f32 %v598_v12, %v597_v7  ;;  %v590_v19 = vadd.f32 %v589_v17, %v588_v15 }
 0x1cf   : > { %v600_v18 = vrot.slane %v599_v14, 2  ;;  %910 = vrcp.f32 %v590_v19 }
 0x1d0   : > { %640 = vmatpush.bf16.msrb.mxu1 %v609_v9 }
 0x1d1   : > { %v601_v20 = vadd.f32 %v600_v18, %v599_v14 }
 0x1d3   : > { %842 = vmatmul.msk.bf16.vlgmr.msrb.gmra.mxu1 %vm616_vm3, %v607_v6  ;;  %v602_v22 = vrot.slane %v601_v20, 1 }
 0x1d5   : > { %v603_v24 = vadd.f32 %v602_v22, %v601_v20  ;;  %v911_v26 = vpop.eup %910 }
 0x1d7   : > { %912 = vrcp.f32 %v603_v24 }
 0x1dd   : > { %v913_v30 = vpop.eup %912 }
 0x226   : > { %v653_v35 = vpop.permute.xlu1 %652 }
 0x249   : > { %v629_v21 = vpop.f32.mrf.mxu0 }
 0x24a   : > { %v646_v23 = vmul.f32 %v911_v26, %v629_v21 }
 0x24c   : > { %843 = vmatpush.msk.msra.mxu0 %vm658_vm4, %v646_v23 }
 0x24d   : > { %844 = vmatmul.msk.f32.vlgmr.msra.gmra.mxu0 %vm426_vm2, %v648_v28 }
 0x250   : > { %v642_v32 = vpop.f32.mrf.mxu1 }
 0x251   : > { %v631_v25 = vpop.f32.mrf.mxu0  ;;  %v647_v27 = vmul.f32 %v913_v30, %v642_v32 }
 0x253   : > { %845 = vmatpush.msk.msra.mxu1 %vm658_vm4, %v647_v27 }
 0x254   : > { %846 = vmatmul.msk.f32.vlgmr.msra.gmra.mxu1 %vm426_vm2, %v648_v28 }
 0x258   : > { %v644_v34 = vpop.f32.mrf.mxu1 }
 0x2ca   : > { %v682_v29 = vpop.f32.mrf.mxu0 }
 0x2cb   : > { %v683_v36 = vadd.f32 %v682_v29, %v653_v35 }
 0x2cd   : > { %v705_v37 = vadd.f32 %v683_v36, %v1011_v3 }
 0x2cf   : > { %707 = vst [vmem:[%s350_s8] sm:$0xff] %v705_v37 }
 0x2d1   : > { %v702_v38 = vpop.f32.mrf.mxu1 }
 0x2d2   : > { %v703_v39 = vadd.f32 %v702_v38, %v653_v35 }
 0x2d4   : > { %v706_v33 = vadd.f32 %v703_v39, %v1013_v4 }
 0x2d6   : > { %708 = vst [vmem:[%s350_s8 + $0x8] sm:$0xff] %v706_v33 }
 0x2d7 PF: > { %s17_s26 = sadd.s32 1, %s936_s26   ;;  %s1104_s24 = smov %s932_s25 }
 0x2d8   : > { %p14_p5 = scmp.ge.s32.totalorder %s17_s26, 4   ;;  %s1105_s25 = smov %s1107_s27 }
 0x2da   :  { %16 = sbr.rel (!%p14_p5) target bundleno = 2 (0x2), region = 84 }

</bundles_post_ra>
